<compile_context>
chip_gen: v6e
topology: v6e:2x2x1
jax: 0.10.0
libtpu: 0.0.40
codegen_flags: <defaults>
</compile_context>

<pallas_src>
import functools

import jax
import jax.numpy as jnp
from jax import lax
from jax.experimental import pallas as pl
from jax.experimental.pallas import tpu as pltpu


_OUT_RAW = 2      # real output width of dense3
_OUT_PAD = 128    # lane-dense padded output width (extra columns are zeros)


def _discriminator_kernel(x_ref, scale_ref, w1_ref, b1_ref, w2_ref, b2_ref,
                          w3_ref, b3_ref, o_ref, *, inv_tau):
    x = x_ref[...]                                     # (TB, N) f32
    n = x.shape[-1]

    # ---------------- NeuralSort ----------------
    # rowsum[b, i] = sum_k |x[b, i] - x[b, k]|   (rows of the "B" matrix)
    diff = x[:, :, None] - x[:, None, :]               # (TB, N, N)
    abs_diff = jnp.abs(diff)
    if n >= 128:
        # Large N: lane reduction on the MXU instead of the XLU.
        ones_col = jnp.ones((n, 1), jnp.float32)
        rowsum = lax.dot_general(
            abs_diff, ones_col,
            dimension_numbers=(((2,), (0,)), ((), ())),
            preferred_element_type=jnp.float32)[..., 0]          # (TB, N)
    else:
        rowsum = jnp.sum(abs_diff, axis=-1)                      # (TB, N)

    # scale_ref[j, i] = ((N + 1) - 2 * (j + 1)) / tau  (constant along lanes i)
    # p[b, j, i] = (x[b, i] * scaling[j] - rowsum[b, i]) / tau
    # (this already includes the .permute(0, 2, 1) from the torch code and the
    #  division by tau, folded into scale_ref / inv_tau)
    scale = scale_ref[...]                                       # (N, N)
    p = scale[None, :, :] * x[:, None, :] - (rowsum * inv_tau)[:, None, :]

    # softmax over last axis; one reciprocal per row instead of N divides
    z = p - jnp.max(p, axis=-1, keepdims=True)
    e = jnp.exp(z)
    s = jnp.sum(e, axis=-1, keepdims=True)
    p_hat = e * (1.0 / s)                                        # (TB, N, N)

    # x_sorted[b, j] = sum_i P_hat[b, j, i] * x[b, i]
    if n >= 128:
        x_sorted = jnp.einsum('bji,bi->bj', p_hat, x,
                              preferred_element_type=jnp.float32)
    else:
        x_sorted = jnp.sum(p_hat * x[:, None, :], axis=-1)       # (TB, N)

    # ---------------- MLP head ----------------
    h = jnp.dot(x_sorted, w1_ref[...],
                preferred_element_type=jnp.float32) + b1_ref[...]
    h = jnp.where(h > 0, h, 0.01 * h)                  # LeakyReLU(0.01)
    h = jnp.dot(h, w2_ref[...],
                preferred_element_type=jnp.float32) + b2_ref[...]
    h = jnp.where(h > 0, h, 0.01 * h)                  # LeakyReLU(0.01)
    out = jnp.dot(h, w3_ref[...],
                  preferred_element_type=jnp.float32) + b3_ref[...]
    o_ref[...] = out                                   # (TB, 128) lane-dense


def _vmem_capacity_bytes():
    """Physical VMEM per TensorCore; conservative fallback if query fails."""
    try:
        return int(pltpu.get_tpu_info().vmem_capacity_bytes)
    except Exception:
        return 64 * 1024 * 1024   # v7x per-TC size == smallest across gens


def _choose_batch_tile(n, b_pad8, vmem_bytes):
    # ~4 live (TB, N, N) f32 slabs (diff, p, exp, p_hat) dominate the working
    # set; keep them inside ~40% of VMEM, leaving room for double-buffered
    # x / output tiles and the constant weight blocks.
    budget = int(vmem_bytes * 0.4)
    bytes_per_row = 4 * n * n * 4
    tb = budget // max(bytes_per_row, 1)
    tb = max(8, min(int(tb), 512))
    tb = (tb // 8) * 8                 # sublane multiple
    tb = min(tb, b_pad8)               # don't over-pad tiny batches
    return max(8, tb)


def discriminator_forward(x, params, tau=1.0):
    """x: (B, pnl_size) f32. params: dict of transposed weights / row biases."""
    b, n = x.shape
    vmem_bytes = _vmem_capacity_bytes()

    b_pad8 = ((b + 7) // 8) * 8
    tb = _choose_batch_tile(n, b_pad8, vmem_bytes)
    b_pad = ((b + tb - 1) // tb) * tb
    grid = (b_pad // tb,)

    x_pad = x if b_pad == b else jnp.pad(x, ((0, b_pad - b), (0, 0)))

    # Host-precomputed scaling, already divided by tau, replicated along lanes
    # so the in-kernel broadcast multiply needs no relayout.
    scaling = (n + 1 - 2.0 * (jnp.arange(n, dtype=jnp.float32) + 1.0)) / tau
    scale_mat = jnp.broadcast_to(scaling[:, None], (n, n)).astype(jnp.float32)

    # Lane-dense dense3: zero-pad to 128 output columns.
    w3p = jnp.zeros((n, _OUT_PAD), jnp.float32).at[:, :_OUT_RAW].set(params["w3"])
    b3p = jnp.zeros((1, _OUT_PAD), jnp.float32).at[:, :_OUT_RAW].set(params["b3"])

    def const(block_shape):
        return pl.BlockSpec(block_shape, lambda i: (0, 0))

    out_pad = pl.pallas_call(
        functools.partial(_discriminator_kernel, inv_tau=float(1.0 / tau)),
        out_shape=jax.ShapeDtypeStruct((b_pad, _OUT_PAD), jnp.float32),
        grid_spec=pltpu.PrefetchScalarGridSpec(
            num_scalar_prefetch=0,
            grid=grid,
            in_specs=[
                pl.BlockSpec((tb, n), lambda i: (i, 0)),       # x batch tile
                const((n, n)),                                 # scaling / tau
                const((n, n)), const((1, n)),                  # dense1
                const((n, n)), const((1, n)),                  # dense2
                const((n, _OUT_PAD)), const((1, _OUT_PAD)),    # dense3 (padded)
            ],
            out_specs=pl.BlockSpec((tb, _OUT_PAD), lambda i: (i, 0)),
        ),
        compiler_params=pltpu.CompilerParams(
            dimension_semantics=("parallel",),          # shards across v7x's 2 TCs
            vmem_limit_bytes=int(vmem_bytes * 0.75),
        ),
    )(x_pad, scale_mat, params["w1"], params["b1"],
      params["w2"], params["b2"], w3p, b3p)

    return out_pad[:b, :_OUT_RAW]


def _reference_forward(x, params, tau=1.0):
    """Pure-JAX reference matching the torch module semantics."""
    B, N = x.shape
    scores = x[:, :, None]                                   # (B, N, 1)
    a = jnp.abs(scores - jnp.transpose(scores, (0, 2, 1)))   # (B, N, N)
    b_mat = a @ jnp.ones((N, N), jnp.float32)                # (B, N, N)
    scaling = (N + 1 - 2 * (jnp.arange(N) + 1)).astype(jnp.float32)
    c = scores @ scaling[None, :]                            # (B, N, N)
    p_max = jnp.transpose(c - b_mat, (0, 2, 1))
    p_hat = jax.nn.softmax(p_max / tau, axis=-1)
    xs = (p_hat @ x[:, :, None])[..., 0]                     # (B, N)

    def lrelu(v):
        return jnp.where(v > 0, v, 0.01 * v)

    h = lrelu(xs @ params["w1"] + params["b1"])
    h = lrelu(h @ params["w2"] + params["b2"])
    return h @ params["w3"] + params["b3"]


def init_params(key, pnl_size):
    k1, k2, k3, k4, k5, k6 = jax.random.split(key, 6)
    scale = 1.0 / jnp.sqrt(pnl_size)
    # stored as (in, out), i.e. already transposed relative to torch nn.Linear
    return {
        "w1": jax.random.uniform(k1, (pnl_size, pnl_size), jnp.float32, -scale, scale),
        "b1": jax.random.uniform(k2, (1, pnl_size), jnp.float32, -scale, scale),
        "w2": jax.random.uniform(k3, (pnl_size, pnl_size), jnp.float32, -scale, scale),
        "b2": jax.random.uniform(k4, (1, pnl_size), jnp.float32, -scale, scale),
        "w3": jax.random.uniform(k5, (pnl_size, 2), jnp.float32, -scale, scale),
        "b3": jax.random.uniform(k6, (1, 2), jnp.float32, -scale, scale),
    }


if __name__ == "__main__":
    key = jax.random.PRNGKey(0)
    kx, kp = jax.random.split(key)

    batch, pnl_size = 2, 8
    x = jax.random.normal(kx, (batch, pnl_size), jnp.float32)
    params = init_params(kp, pnl_size)

    out = discriminator_forward(x, params, tau=1.0)
    out = jax.block_until_ready(out)

    ref = _reference_forward(x, params, tau=1.0)
    assert out.shape == (batch, 2)
    assert jnp.allclose(out, ref, atol=1e-5, rtol=1e-5), (out, ref)

    print("KERNEL_OK")
</pallas_src>

<mosaic_0001>
module attributes {stable_mosaic.version = 11 : i64} {
  func.func @_discriminator_kernel(%arg0: i32, %arg1: memref<8x8xf32, #tpu.memory_space<vmem>>, %arg2: memref<8x8xf32, #tpu.memory_space<vmem>>, %arg3: memref<8x8xf32, #tpu.memory_space<vmem>>, %arg4: memref<1x8xf32, #tpu.memory_space<vmem>>, %arg5: memref<8x8xf32, #tpu.memory_space<vmem>>, %arg6: memref<1x8xf32, #tpu.memory_space<vmem>>, %arg7: memref<8x128xf32, #tpu.memory_space<vmem>>, %arg8: memref<1x128xf32, #tpu.memory_space<vmem>>, %arg9: memref<8x128xf32, #tpu.memory_space<vmem>>) attributes {dimension_semantics = [#tpu.dimension_semantics<parallel>], iteration_bounds = array<i64: 1>, scalar_prefetch = 0 : i64, scratch_operands = 0 : i64, tpu.core_type = #tpu.core_type<tc>, window_params = [{transform_indices = @transform_0, window_bounds = array<i64: 8, 8>}, {pipeline_mode = #tpu.pipeline_mode<synchronous>, transform_indices = @transform_1, window_bounds = array<i64: 8, 8>}, {pipeline_mode = #tpu.pipeline_mode<synchronous>, transform_indices = @transform_2, window_bounds = array<i64: 8, 8>}, {pipeline_mode = #tpu.pipeline_mode<synchronous>, transform_indices = @transform_3, window_bounds = array<i64: 1, 8>}, {pipeline_mode = #tpu.pipeline_mode<synchronous>, transform_indices = @transform_4, window_bounds = array<i64: 8, 8>}, {pipeline_mode = #tpu.pipeline_mode<synchronous>, transform_indices = @transform_5, window_bounds = array<i64: 1, 8>}, {pipeline_mode = #tpu.pipeline_mode<synchronous>, transform_indices = @transform_6, window_bounds = array<i64: 8, 128>}, {pipeline_mode = #tpu.pipeline_mode<synchronous>, transform_indices = @transform_7, window_bounds = array<i64: 1, 128>}, {transform_indices = @transform_8, window_bounds = array<i64: 8, 128>}]} {
    %c0 = arith.constant 0 : index
    %c0_0 = arith.constant 0 : index
    %0 = vector.load %arg1[%c0, %c0_0] : memref<8x8xf32, #tpu.memory_space<vmem>>, vector<8x8xf32>
    %1 = vector.shape_cast %0 : vector<8x8xf32> to vector<8x8x1xf32>
    %2 = vector.shape_cast %0 : vector<8x8xf32> to vector<8x1x8xf32>
    %3 = vector.broadcast %1 : vector<8x8x1xf32> to vector<8x8x8xf32>
    %4 = vector.broadcast %2 : vector<8x1x8xf32> to vector<8x8x8xf32>
    %5 = arith.subf %3, %4 : vector<8x8x8xf32>
    %6 = math.absf %5 : vector<8x8x8xf32>
    %cst = arith.constant dense<0.000000e+00> : vector<8x8xf32>
    %7 = vector.multi_reduction <add>, %6, %cst [2] : vector<8x8x8xf32> to vector<8x8xf32>
    %c0_1 = arith.constant 0 : index
    %c0_2 = arith.constant 0 : index
    %8 = vector.load %arg2[%c0_1, %c0_2] : memref<8x8xf32, #tpu.memory_space<vmem>>, vector<8x8xf32>
    %9 = vector.shape_cast %8 : vector<8x8xf32> to vector<1x8x8xf32>
    %10 = vector.shape_cast %0 : vector<8x8xf32> to vector<8x1x8xf32>
    %11 = vector.broadcast %9 : vector<1x8x8xf32> to vector<8x8x8xf32>
    %12 = vector.broadcast %10 : vector<8x1x8xf32> to vector<8x8x8xf32>
    %13 = arith.mulf %11, %12 : vector<8x8x8xf32>
    %cst_3 = arith.constant 1.000000e+00 : f32
    %14 = vector.broadcast %cst_3 : f32 to vector<8x8xf32>
    %15 = arith.mulf %7, %14 : vector<8x8xf32>
    %16 = vector.shape_cast %15 : vector<8x8xf32> to vector<8x1x8xf32>
    %17 = vector.broadcast %16 : vector<8x1x8xf32> to vector<8x8x8xf32>
    %18 = arith.subf %13, %17 : vector<8x8x8xf32>
    %cst_4 = arith.constant dense<0xFF800000> : vector<8x8xf32>
    %19 = vector.multi_reduction <maximumf>, %18, %cst_4 [2] : vector<8x8x8xf32> to vector<8x8xf32>
    %20 = vector.shape_cast %19 : vector<8x8xf32> to vector<8x8x1xf32>
    %21 = vector.broadcast %20 : vector<8x8x1xf32> to vector<8x8x8xf32>
    %22 = arith.subf %18, %21 : vector<8x8x8xf32>
    %23 = math.exp %22 : vector<8x8x8xf32>
    %cst_5 = arith.constant dense<0.000000e+00> : vector<8x8xf32>
    %24 = vector.multi_reduction <add>, %23, %cst_5 [2] : vector<8x8x8xf32> to vector<8x8xf32>
    %25 = vector.shape_cast %24 : vector<8x8xf32> to vector<8x8x1xf32>
    %cst_6 = arith.constant 1.000000e+00 : f32
    %26 = vector.broadcast %cst_6 : f32 to vector<8x8x1xf32>
    %27 = arith.divf %26, %25 : vector<8x8x1xf32>
    %28 = vector.broadcast %27 : vector<8x8x1xf32> to vector<8x8x8xf32>
    %29 = arith.mulf %23, %28 : vector<8x8x8xf32>
    %30 = vector.shape_cast %0 : vector<8x8xf32> to vector<8x1x8xf32>
    %31 = vector.broadcast %30 : vector<8x1x8xf32> to vector<8x8x8xf32>
    %32 = arith.mulf %29, %31 : vector<8x8x8xf32>
    %cst_7 = arith.constant dense<0.000000e+00> : vector<8x8xf32>
    %33 = vector.multi_reduction <add>, %32, %cst_7 [2] : vector<8x8x8xf32> to vector<8x8xf32>
    %c0_8 = arith.constant 0 : index
    %c0_9 = arith.constant 0 : index
    %34 = vector.load %arg3[%c0_8, %c0_9] : memref<8x8xf32, #tpu.memory_space<vmem>>, vector<8x8xf32>
    %cst_10 = arith.constant dense<0.000000e+00> : vector<8x8xf32>
    %35 = tpu.matmul %33, %34, %cst_10 {dimension_numbers = #tpu.dot_dimension_numbers<[1], [0], [0], [1], [0, 0, 1, 1], [], []>} : vector<8x8xf32>, vector<8x8xf32>, vector<8x8xf32> -> vector<8x8xf32>
    %c0_11 = arith.constant 0 : index
    %c0_12 = arith.constant 0 : index
    %36 = vector.load %arg4[%c0_11, %c0_12] : memref<1x8xf32, #tpu.memory_space<vmem>>, vector<1x8xf32>
    %37 = vector.broadcast %36 : vector<1x8xf32> to vector<8x8xf32>
    %38 = arith.addf %35, %37 : vector<8x8xf32>
    %cst_13 = arith.constant 0.000000e+00 : f32
    %39 = vector.broadcast %cst_13 : f32 to vector<8x8xf32>
    %40 = arith.cmpf ogt, %38, %39 : vector<8x8xf32>
    %cst_14 = arith.constant 0.00999999977 : f32
    %41 = vector.broadcast %cst_14 : f32 to vector<8x8xf32>
    %42 = arith.mulf %41, %38 : vector<8x8xf32>
    %43 = arith.select %40, %38, %42 : vector<8x8xi1>, vector<8x8xf32>
    %c0_15 = arith.constant 0 : index
    %c0_16 = arith.constant 0 : index
    %44 = vector.load %arg5[%c0_15, %c0_16] : memref<8x8xf32, #tpu.memory_space<vmem>>, vector<8x8xf32>
    %cst_17 = arith.constant dense<0.000000e+00> : vector<8x8xf32>
    %45 = tpu.matmul %43, %44, %cst_17 {dimension_numbers = #tpu.dot_dimension_numbers<[1], [0], [0], [1], [0, 0, 1, 1], [], []>} : vector<8x8xf32>, vector<8x8xf32>, vector<8x8xf32> -> vector<8x8xf32>
    %c0_18 = arith.constant 0 : index
    %c0_19 = arith.constant 0 : index
    %46 = vector.load %arg6[%c0_18, %c0_19] : memref<1x8xf32, #tpu.memory_space<vmem>>, vector<1x8xf32>
    %47 = vector.broadcast %46 : vector<1x8xf32> to vector<8x8xf32>
    %48 = arith.addf %45, %47 : vector<8x8xf32>
    %cst_20 = arith.constant 0.000000e+00 : f32
    %49 = vector.broadcast %cst_20 : f32 to vector<8x8xf32>
    %50 = arith.cmpf ogt, %48, %49 : vector<8x8xf32>
    %cst_21 = arith.constant 0.00999999977 : f32
    %51 = vector.broadcast %cst_21 : f32 to vector<8x8xf32>
    %52 = arith.mulf %51, %48 : vector<8x8xf32>
    %53 = arith.select %50, %48, %52 : vector<8x8xi1>, vector<8x8xf32>
    %c0_22 = arith.constant 0 : index
    %c0_23 = arith.constant 0 : index
    %54 = vector.load %arg7[%c0_22, %c0_23] : memref<8x128xf32, #tpu.memory_space<vmem>>, vector<8x128xf32>
    %cst_24 = arith.constant dense<0.000000e+00> : vector<8x128xf32>
    %55 = tpu.matmul %53, %54, %cst_24 {dimension_numbers = #tpu.dot_dimension_numbers<[1], [0], [0], [1], [0, 0, 1, 1], [], []>} : vector<8x8xf32>, vector<8x128xf32>, vector<8x128xf32> -> vector<8x128xf32>
    %c0_25 = arith.constant 0 : index
    %c0_26 = arith.constant 0 : index
    %56 = vector.load %arg8[%c0_25, %c0_26] : memref<1x128xf32, #tpu.memory_space<vmem>>, vector<1x128xf32>
    %57 = vector.broadcast %56 : vector<1x128xf32> to vector<8x128xf32>
    %58 = arith.addf %55, %57 : vector<8x128xf32>
    %c0_27 = arith.constant 0 : index
    %c0_28 = arith.constant 0 : index
    %59 = vector.load %arg9[%c0_27, %c0_28] : memref<8x128xf32, #tpu.memory_space<vmem>>, vector<8x128xf32>
    tpu.vector_store %arg9[%c0_27, %c0_28], %58 {strides = array<i32>} : memref<8x128xf32, #tpu.memory_space<vmem>>, vector<8x128xf32>,
    return
  }
  func.func @transform_0(%arg0: i32) -> (i32, i32) {
    %c0_i32 = arith.constant 0 : i32
    %c0_i32_0 = arith.constant 0 : i32
    return %arg0, %c0_i32 : i32, i32
  }
  func.func @transform_1(%arg0: i32) -> (i32, i32) {
    %c0_i32 = arith.constant 0 : i32
    %c0_i32_0 = arith.constant 0 : i32
    %c0_i32_1 = arith.constant 0 : i32
    return %c0_i32, %c0_i32_0 : i32, i32
  }
  func.func @transform_2(%arg0: i32) -> (i32, i32) {
    %c0_i32 = arith.constant 0 : i32
    %c0_i32_0 = arith.constant 0 : i32
    %c0_i32_1 = arith.constant 0 : i32
    return %c0_i32, %c0_i32_0 : i32, i32
  }
  func.func @transform_3(%arg0: i32) -> (i32, i32) {
    %c0_i32 = arith.constant 0 : i32
    %c0_i32_0 = arith.constant 0 : i32
    %c0_i32_1 = arith.constant 0 : i32
    return %c0_i32, %c0_i32_0 : i32, i32
  }
  func.func @transform_4(%arg0: i32) -> (i32, i32) {
    %c0_i32 = arith.constant 0 : i32
    %c0_i32_0 = arith.constant 0 : i32
    %c0_i32_1 = arith.constant 0 : i32
    return %c0_i32, %c0_i32_0 : i32, i32
  }
  func.func @transform_5(%arg0: i32) -> (i32, i32) {
    %c0_i32 = arith.constant 0 : i32
    %c0_i32_0 = arith.constant 0 : i32
    %c0_i32_1 = arith.constant 0 : i32
    return %c0_i32, %c0_i32_0 : i32, i32
  }
  func.func @transform_6(%arg0: i32) -> (i32, i32) {
    %c0_i32 = arith.constant 0 : i32
    %c0_i32_0 = arith.constant 0 : i32
    %c0_i32_1 = arith.constant 0 : i32
    return %c0_i32, %c0_i32_0 : i32, i32
  }
  func.func @transform_7(%arg0: i32) -> (i32, i32) {
    %c0_i32 = arith.constant 0 : i32
    %c0_i32_0 = arith.constant 0 : i32
    %c0_i32_1 = arith.constant 0 : i32
    return %c0_i32, %c0_i32_0 : i32, i32
  }
  func.func @transform_8(%arg0: i32) -> (i32, i32) {
    %c0_i32 = arith.constant 0 : i32
    %c0_i32_0 = arith.constant 0 : i32
    return %arg0, %c0_i32 : i32, i32
  }
}

</mosaic_0001>

<bundles_post_ra>
// kernel: tpu_custom_call.1
= control target key start
LH: loop header
LB: loop body
LE: loop exit
PB: predicated region body
PF: predicated region fallthrough
CT: control target
= control target key end

     0   :  { %13 = vsyncpa [#allocation3], 0  ;;  %s1180_s0 = inlined_call_operand.hbm [shape: f32[8,8], index: 0, kind: input, shape index: {}]   ;;  %s1181_s1 = inlined_call_operand.hbm [shape: f32[8,8], index: 1, kind: input, shape index: {}]   ;;  %s1182_s2 = inlined_call_operand.hbm [shape: f32[8,8], index: 2, kind: input, shape index: {}]   ;;  %s1183_s3 = inlined_call_operand.vmem [shape: f32[1,8], index: 3, kind: input, shape index: {}]   ;;  %s1184_s4 = inlined_call_operand.hbm [shape: f32[8,8], index: 4, kind: input, shape index: {}]   ;;  %s1185_s5 = inlined_call_operand.vmem [shape: f32[1,8], index: 5, kind: input, shape index: {}]   ;;  %s1186_s6 = inlined_call_operand.vmem [shape: f32[8,128], index: 6, kind: input, shape index: {}]   ;;  %s1187_s7 = inlined_call_operand.vmem [shape: f32[1,128], index: 7, kind: input, shape index: {}]   ;;  %s1188_s8 = inlined_call_operand.hbm [shape: f32[8,128], index: 8, kind: output, shape index: {}]  }
   0x1   :  { %14 = vsyncpa [#allocation6], 0 }
   0x2   :  { %15 = vsyncpa [#allocation9], 0 }
   0x3   :  { %16 = vsyncpa [#allocation4], 0  ;;  %s1004_s27 = smov [#allocation5]   ;;  %s1005_s29 = smov [#allocation2]  }
   0x4   :  { %s33_s28 = sshll.u32 %s1004_s27, 4  ;;  %s23_s30 = sshll.u32 %s1005_s29, 4  ;;  %s34_s28 = int_to_ptr.vmem [resolvable:$true] %s33_s28  ;;  %s24_s30 = int_to_ptr.vmem [resolvable:$true] %s23_s30 }
   0x5   :  { %s904_s9 = scalar_lea.vmem %s34_s28, 128  ;;  %p909_p1 = scmp.lt.s32.totalorder %s34_s28, %s34_s28 }
   0x6   :  { %p905_p0 = scmp.ne.s32.totalorder %s34_s28, %s904_s9  ;;  %p910_p2 = scmp.lt.s32.totalorder %s904_s9, %s904_s9 }
   0x8   :  { %p911_p3 = por %p910_p2, %p909_p1 }
   0xa   :  { %p912_p4 = pnand %p911_p3, %p905_p0 }
   0xc   :  { %915 = shalt.err (!%p912_p4)
}
   0xd   :  { %36 = dma.hbm_to_vmem [thread:$0]  %s1181_s1, 128, %s34_s28, [#allocation6]  }
   0xe   :  { %s924_s12 = scalar_lea.vmem %s24_s30, 128  ;;  %p929_p6 = scmp.lt.s32.totalorder %s24_s30, %s24_s30 }
   0xf   :  { %p925_p5 = scmp.ne.s32.totalorder %s24_s30, %s924_s12  ;;  %p930_p7 = scmp.lt.s32.totalorder %s924_s12, %s924_s12 }
  0x11   :  { %p931_p8 = por %p930_p7, %p929_p6 }
  0x13   :  { %p932_p9 = pnand %p931_p8, %p925_p5 }
  0x15   :  { %935 = shalt.err (!%p932_p9)
}
  0x16   :  { %26 = dma.hbm_to_vmem [thread:$0]  %s1180_s0, 128, %s24_s30, [#allocation3]  }
  0x17   :  { %s1006_s15 = smov [#allocation7]   ;;  %s1007_s17 = smov [#allocation8]  }
  0x18   :  { %s43_s16 = sshll.u32 %s1006_s15, 4  ;;  %s55_s18 = sshll.u32 %s1007_s17, 4  ;;  %s44_s16 = int_to_ptr.vmem [resolvable:$true] %s43_s16  ;;  %s56_s18 = int_to_ptr.vmem [resolvable:$true] %s55_s18 }
  0x19   :  { %s944_s19 = scalar_lea.vmem %s44_s16, 128  ;;  %p949_p11 = scmp.lt.s32.totalorder %s44_s16, %s44_s16 }
  0x1a   :  { %p945_p10 = scmp.ne.s32.totalorder %s44_s16, %s944_s19  ;;  %p950_p12 = scmp.lt.s32.totalorder %s944_s19, %s944_s19 }
  0x1c   :  { %p951_p13 = por %p950_p12, %p949_p11 }
  0x1e   :  { %p952_p0 = pnand %p951_p13, %p945_p10 }
  0x20   :  { %955 = shalt.err (!%p952_p0)
}
  0x21   :  { %46 = dma.hbm_to_vmem [thread:$0]  %s1182_s2, 128, %s44_s16, [#allocation6]  }
  0x22   :  { %s964_s21 = scalar_lea.vmem %s56_s18, 128  ;;  %p969_p2 = scmp.lt.s32.totalorder %s56_s18, %s56_s18 }
  0x23   :  { %p965_p1 = scmp.ne.s32.totalorder %s56_s18, %s964_s21  ;;  %p970_p3 = scmp.lt.s32.totalorder %s964_s21, %s964_s21 }
  0x25   :  { %p971_p4 = por %p970_p3, %p969_p2 }
  0x27   :  { %p972_p5 = pnand %p971_p4, %p965_p1 }
  0x29   :  { %975 = shalt.err (!%p972_p5)
}
  0x2a   :  { %58 = dma.hbm_to_vmem [thread:$0]  %s1184_s4, 128, %s56_s18, [#allocation9]  }
  0x2b   :  { %996 = dma.done.wait [#allocation3], 128  }
  0x2c   :  { %997 = vsyncadd [#allocation3], 4294967168 }
  0x2d   :  { %998 = dma.done.wait [#allocation6], 256  }
  0x2e   :  { %999 = vsyncadd [#allocation6], 4294967040 }
  0x2f   :  { %1000 = dma.done.wait [#allocation9], 128  }
  0x30   :  { %1001 = vsyncadd [#allocation9], 4294967168  ;;  %v78_v0 = vlaneseq  ;;  %v1008_v1 = vmov 1966171168   ;;  %v77_v12 = vld [vmem:[#allocation2] sm:$0xff]  ;;  %vm240_vm0 = vcmask 64512  }
  0x31   :  { %v137_v2 = vunpack.c.l.s4 %v1008_v1  ;;  %v135_v20 = vcombine.high %v77_v12, %v77_v12  ;;  %vm1010_vm1 = vmmov 0   ;;  %vm316_vm2 = vcmask 1041409   ;;  %s1011_s28 = smov [#allocation10]  }
  0x32   :  { %v79_v3 = vshrl.u32 %v78_v0, 7  ;;  %v283_v4 = vand.u32 127, %v78_v0  ;;  %vm317_vm3 = vcmask 1042434   ;;  %vm319_vm4 = vcmask 1043459   ;;  %s817_s29 = sshll.u32 %s1011_s28, 4  ;;  %s818_s29 = int_to_ptr.vmem [resolvable:$true] %s817_s29 }
  0x33   :  { %v138_v5 = vunpack.c.0.s8 %v137_v2  ;;  %vm321_vm5 = vcmask 1044484   ;;  %vm323_vm6 = vcmask 1045509   ;;  %vm325_vm7 = vcmask 1046534   ;;  %p981_p7 = scmp.lt.s32.totalorder %s818_s29, %s818_s29 }
  0x34   :  { %v80_v6 = vsub.s32 0, %v79_v3  ;;  %v1069_v7 = vsub.s32 %v283_v4, %v79_v3  ;;  %v94_v8 = vsub.s32 2, %v79_v3  ;;  %v87_v9 = vsub.s32 1, %v79_v3 }
  0x35   :  { %v101_v10 = vsub.s32 3, %v79_v3  ;;  %v141_v11 = vsub.s32 %v138_v5, %v79_v3  ;;  %v108_v16 = vsub.s32 4, %v79_v3  ;;  %v115_v17 = vsub.s32 5, %v79_v3 }
  0x36   :  { %v81_v13 = vrot.slane %v77_v12, %v80_v6  ;;  %v95_v14 = vrot.slane %v77_v12, %v94_v8  ;;  %v88_v15 = vrot.slane %v77_v12, %v87_v9  ;;  %v122_v26 = vsub.s32 6, %v79_v3 }
  0x37   :  { %v102_v18 = vrot.slane %v77_v12, %v101_v10  ;;  %v142_v19 = vrot.slane %v77_v12, %v141_v11  ;;  %v149_v23 = vrot.slane %v135_v20, %v141_v11  ;;  %v109_v24 = vrot.slane %v77_v12, %v108_v16 }
  0x38   :  { %83 = vbcast.lane.b32.xlu0 %v81_v13, 256  ;;  %97 = vbcast.lane.b32.xlu1 %v95_v14, 256  ;;  %v116_v25 = vrot.slane %v77_v12, %v115_v17  ;;  %v129_v27 = vsub.s32 7, %v79_v3  ;;  %v123_v39 = vrot.slane %v77_v12, %v122_v26  ;;  %vm327_vm8 = vcmask 1047559  }
  0x39   :  { %v158_v21 = vrot.slane %v142_v19, %v141_v11  ;;  %v150_v22 = vcombine.high %v142_v19, %v142_v19  ;;  %v165_v31 = vrot.slane %v149_v23, %v141_v11  ;;  %v151_v32 = vcombine.high %v149_v23, %v149_v23 }
  0x3a   :  { %v130_v40 = vrot.slane %v77_v12, %v129_v27 }
  0x3b   :  { %v1071_v28 = vrot.slane %v158_v21, %v80_v6  ;;  %v180_v29 = vcombine.high %v158_v21, %v158_v21  ;;  %v172_v30 = vrot.slane %v150_v22, %v141_v11  ;;  %v1077_v36 = vrot.slane %v165_v31, %v80_v6 }
  0x3c   :  { %90 = vbcast.lane.b32.xlu0 %v88_v15, 256  ;;  %104 = vbcast.lane.b32.xlu1 %v102_v18, 256  ;;  %v179_v37 = vrot.slane %v151_v32, %v141_v11  ;;  %v181_v38 = vcombine.high %v165_v31, %v165_v31  ;;  %v265_v15 = vld [vmem:[#allocation5] sm:$0xff] }
  0x3d   :  { %v1073_v33 = vrot.slane %v180_v29, %v80_v6  ;;  %v1075_v34 = vrot.slane %v172_v30, %v80_v6  ;;  %v182_v35 = vcombine.high %v172_v30, %v172_v30  ;;  %v266_v16 = vmul.f32 %v265_v15, %v1071_v28 }
  0x3e   :  { %v1081_v42 = vrot.slane %v179_v37, %v80_v6  ;;  %v1083_v43 = vrot.slane %v181_v38, %v80_v6  ;;  %v183_v44 = vcombine.high %v179_v37, %v179_v37  ;;  %v270_v30 = vmul.f32 %v265_v15, %v1077_v36 }
  0x3f   :  { %v1079_v41 = vrot.slane %v182_v35, %v80_v6  ;;  %v267_v20 = vmul.f32 %v265_v15, %v1075_v34  ;;  %v268_v21 = vmul.f32 %v265_v15, %v1073_v33 }
  0x40   :  { %111 = vbcast.lane.b32.xlu0 %v109_v24, 256  ;;  %118 = vbcast.lane.b32.xlu1 %v116_v25, 256  ;;  %v1085_v45 = vrot.slane %v183_v44, %v80_v6 }
  0x41   :  { %v269_v31 = vmul.f32 %v265_v15, %v1079_v41 }
  0x44   :  { %125 = vbcast.lane.b32.xlu0 %v123_v39, 256  ;;  %132 = vbcast.lane.b32.xlu1 %v130_v40, 256 }
  0xaa   :  { %v84_v46 = vpop.permute.xlu0 %83  ;;  %v98_v47 = vpop.permute.xlu1 %97 }
  0xab   :  { %v224_v48 = vsub.f32 %v84_v46, %v1071_v28  ;;  %v226_v49 = vsub.f32 %v98_v47, %v1073_v33  ;;  %v272_v47 = vmul.f32 %v265_v15, %v1083_v43 }
  0xad   :  { %v232_v50 = vand.u32 2147483647, %v224_v48  ;;  %v234_v51 = vand.u32 2147483647, %v226_v49  ;;  %v271_v48 = vmul.f32 %v265_v15, %v1081_v42 }
  0xae   :  { %v91_v52 = vpop.permute.xlu0 %90  ;;  %v105_v53 = vpop.permute.xlu1 %104 }
  0xaf   :  { %v225_v54 = vsub.f32 %v91_v52, %v1075_v34  ;;  %v241_v55 = vsel %vm240_vm0, %v232_v50, 0.0  ;;  %v227_v56 = vsub.f32 %v105_v53, %v1079_v41  ;;  %v247_v59 = vsel %vm240_vm0, %v234_v51, 0.0 }
  0xb0   :  { %242 = vadd.xlane.f32.xlu0 %v241_v55 }
  0xb1   :  { %v233_v57 = vand.u32 2147483647, %v225_v54  ;;  %v235_v58 = vand.u32 2147483647, %v227_v56 }
  0xb2   :  { %v112_v60 = vpop.permute.xlu0 %111  ;;  %v119_v61 = vpop.permute.xlu1 %118 }
  0xb3   :  { %v228_v62 = vsub.f32 %v112_v60, %v1077_v36  ;;  %v244_v63 = vsel %vm240_vm0, %v233_v57, 0.0  ;;  %v229_v0 = vsub.f32 %v119_v61, %v1081_v42  ;;  %v250_v3 = vsel %vm240_vm0, %v235_v58, 0.0 }
  0xb4   :  { %248 = vadd.xlane.f32.xlu0 %v247_v59  ;;  %245 = vadd.xlane.f32.xlu1 %v244_v63  ;;  %v273_v57 = vmul.f32 %v265_v15, %v1085_v45 }
  0xb5   :  { %v236_v1 = vand.u32 2147483647, %v228_v62  ;;  %v237_v2 = vand.u32 2147483647, %v229_v0 }
  0xb6   :  { %v126_v4 = vpop.permute.xlu0 %125  ;;  %v133_v5 = vpop.permute.xlu1 %132 }
  0xb7   :  { %v230_v6 = vsub.f32 %v126_v4, %v1083_v43  ;;  %v253_v8 = vsel %vm240_vm0, %v236_v1, 0.0  ;;  %v231_v9 = vsub.f32 %v133_v5, %v1085_v45  ;;  %v256_v12 = vsel %vm240_vm0, %v237_v2, 0.0 }
  0xb8   :  { %251 = vadd.xlane.f32.xlu0 %v250_v3  ;;  %254 = vadd.xlane.f32.xlu1 %v253_v8 }
  0xb9   :  { %v238_v10 = vand.u32 2147483647, %v230_v6  ;;  %v239_v11 = vand.u32 2147483647, %v231_v9 }
  0xbb   :  { %v259_v13 = vsel %vm240_vm0, %v238_v10, 0.0  ;;  %v262_v14 = vsel %vm240_vm0, %v239_v11, 0.0 }
  0xbc   :  { %257 = vadd.xlane.f32.xlu0 %v256_v12  ;;  %260 = vadd.xlane.f32.xlu1 %v259_v13 }
  0xc0   :  { %263 = vadd.xlane.f32.xlu0 %v262_v14 }
 0x139   :  { %v243_v17 = vpop.xlane.xlu0 %242 }
 0x13a   :  { %v287_v18 = vrot.slane %v243_v17, %v1069_v7 }
 0x13c   :  { %v379_v19 = vsub.f32 %v266_v16, %v287_v18 }
 0x13d   :  { %v246_v22 = vpop.xlane.xlu1 %245  ;;  %v249_v23 = vpop.xlane.xlu0 %248 }
 0x13e   :  { %v291_v24 = vrot.slane %v246_v22, %v1069_v7  ;;  %v295_v25 = vrot.slane %v249_v23, %v1069_v7  ;;  %v387_v26 = vsel %vm240_vm0, %v379_v19, -inf }
 0x13f   :  { %388 = vmax.xlane.f32.xlu1 %v387_v26 }
 0x140   :  { %v380_v27 = vsub.f32 %v267_v20, %v291_v24  ;;  %v381_v29 = vsub.f32 %v268_v21, %v295_v25 }
 0x141   :  { %v255_v32 = vpop.xlane.xlu1 %254  ;;  %v252_v35 = vpop.xlane.xlu0 %251 }
 0x142   :  { %v303_v37 = vrot.slane %v255_v32, %v1069_v7  ;;  %v299_v38 = vrot.slane %v252_v35, %v1069_v7  ;;  %v390_v39 = vsel %vm240_vm0, %v380_v27, -inf  ;;  %v393_v40 = vsel %vm240_vm0, %v381_v29, -inf }
 0x143   :  { %391 = vmax.xlane.f32.xlu0 %v390_v39  ;;  %394 = vmax.xlane.f32.xlu1 %v393_v40 }
 0x144   :  { %v383_v44 = vsub.f32 %v270_v30, %v303_v37  ;;  %v382_v46 = vsub.f32 %v269_v31, %v299_v38 }
 0x145   :  { %v261_v49 = vpop.xlane.xlu1 %260  ;;  %v258_v50 = vpop.xlane.xlu0 %257 }
 0x146   :  { %v311_v51 = vrot.slane %v261_v49, %v1069_v7  ;;  %v307_v52 = vrot.slane %v258_v50, %v1069_v7  ;;  %v399_v53 = vsel %vm240_vm0, %v383_v44, -inf  ;;  %v396_v54 = vsel %vm240_vm0, %v382_v46, -inf }
 0x147   :  { %400 = vmax.xlane.f32.xlu1 %v399_v53  ;;  %397 = vmax.xlane.f32.xlu0 %v396_v54 }
 0x148   :  { %v385_v55 = vsub.f32 %v272_v47, %v311_v51  ;;  %v384_v56 = vsub.f32 %v271_v48, %v307_v52 }
 0x149   :  { %v264_v58 = vpop.xlane.xlu0 %263 }
 0x14a   :  { %v315_v59 = vrot.slane %v264_v58, %v1069_v7  ;;  %v405_v60 = vsel %vm240_vm0, %v385_v55, -inf  ;;  %v402_v61 = vsel %vm240_vm0, %v384_v56, -inf }
 0x14b   :  { %406 = vmax.xlane.f32.xlu1 %v405_v60  ;;  %403 = vmax.xlane.f32.xlu0 %v402_v61 }
 0x14c   :  { %v386_v62 = vsub.f32 %v273_v57, %v315_v59 }
 0x14e   :  { %v408_v63 = vsel %vm240_vm0, %v386_v62, -inf }
 0x14f   :  { %409 = vmax.xlane.f32.xlu0 %v408_v63 }
 0x1c8   :  { %v389_v0 = vpop.xlane.xlu1 %388 }
 0x1c9   :  { %v411_v1 = vsub.f32 %v379_v19, %v389_v0 }
 0x1cb   :  { %v419_v2 = vmul.f32 1.442695, %v411_v1 }
 0x1cc   :  { %v395_v3 = vpop.xlane.xlu1 %394  ;;  %v392_v4 = vpop.xlane.xlu0 %391 }
 0x1cd   :  { %864 = vpow2.f32 %v419_v2  ;;  %v413_v5 = vsub.f32 %v381_v29, %v395_v3  ;;  %v412_v6 = vsub.f32 %v380_v27, %v392_v4 }
 0x1cf   :  { %v423_v8 = vmul.f32 1.442695, %v413_v5  ;;  %v421_v9 = vmul.f32 1.442695, %v412_v6 }
 0x1d0   :  { %v401_v10 = vpop.xlane.xlu1 %400  ;;  %v398_v11 = vpop.xlane.xlu0 %397 }
 0x1d1   :  { %866 = vpow2.f32 %v423_v8  ;;  %v415_v12 = vsub.f32 %v383_v44, %v401_v10  ;;  %v414_v13 = vsub.f32 %v382_v46, %v398_v11 }
 0x1d2   :  { %868 = vpow2.f32 %v421_v9 }
 0x1d3   :  { %v427_v14 = vmul.f32 1.442695, %v415_v12  ;;  %v425_v15 = vmul.f32 1.442695, %v414_v13 }
 0x1d4   :  { %v407_v16 = vpop.xlane.xlu1 %406  ;;  %v404_v17 = vpop.xlane.xlu0 %403 }
 0x1d5   :  { %870 = vpow2.f32 %v427_v14  ;;  %v417_v18 = vsub.f32 %v385_v55, %v407_v16  ;;  %v416_v19 = vsub.f32 %v384_v56, %v404_v17 }
 0x1d6   :  { %872 = vpow2.f32 %v425_v15 }
 0x1d7   :  { %v431_v20 = vmul.f32 1.442695, %v417_v18  ;;  %v429_v21 = vmul.f32 1.442695, %v416_v19 }
 0x1d8   :  { %v410_v22 = vpop.xlane.xlu0 %409 }
 0x1d9   :  { %874 = vpow2.f32 %v431_v20  ;;  %v418_v23 = vsub.f32 %v386_v62, %v410_v22  ;;  %v1009_v22 = vmov 0.0  }
 0x1da   :  { %v865_v24 = vpop.eup %864  ;;  %876 = vpow2.f32 %v429_v21  ;;  %v515_v21 = vld [vmem:[#allocation7] sm:$0xff]  ;;  %840 = vmatprep.subr.mxu0 %v1009_v22  ;;  %842 = vmatprep.mubr.msk.f32.mxu0 %vm1010_vm1, %v1009_v22 }
 0x1db   :  { %v433_v25 = vmul.f32 1.442695, %v418_v23  ;;  %v435_v26 = vsel %vm240_vm0, %v865_v24, 0.0  ;;  %841 = vmatpush3.msra.mxu0 %v515_v21  ;;  %845 = vmatprep.subr.mxu1 %v1009_v22 }
 0x1dc   :  { %436 = vadd.xlane.f32.xlu1 %v435_v26  ;;  %847 = vmatprep.mubr.msk.f32.mxu1 %vm1010_vm1, %v1009_v22 }
 0x1dd   :  { %878 = vpow2.f32 %v433_v25  ;;  %850 = vmatprep.subr.mxu0 %v1009_v22 }
 0x1de   :  { %v867_v27 = vpop.eup %866 }
 0x1df   :  { %v869_v29 = vpop.eup %868  ;;  %v441_v30 = vsel %vm240_vm0, %v867_v27, 0.0 }
 0x1e0   :  { %442 = vadd.xlane.f32.xlu1 %v441_v30  ;;  %v438_v31 = vsel %vm240_vm0, %v869_v29, 0.0 }
 0x1e1   :  { %439 = vadd.xlane.f32.xlu0 %v438_v31 }
 0x1e2   :  { %v871_v32 = vpop.eup %870 }
 0x1e3   :  { %v873_v35 = vpop.eup %872  ;;  %v447_v37 = vsel %vm240_vm0, %v871_v32, 0.0 }
 0x1e4   :  { %448 = vadd.xlane.f32.xlu1 %v447_v37  ;;  %v444_v38 = vsel %vm240_vm0, %v873_v35, 0.0 }
 0x1e5   :  { %445 = vadd.xlane.f32.xlu0 %v444_v38 }
 0x1e6   :  { %v875_v39 = vpop.eup %874 }
 0x1e7   :  { %v877_v40 = vpop.eup %876  ;;  %v453_v44 = vsel %vm240_vm0, %v875_v39, 0.0 }
 0x1e8   :  { %454 = vadd.xlane.f32.xlu1 %v453_v44  ;;  %v450_v46 = vsel %vm240_vm0, %v877_v40, 0.0 }
 0x1e9   :  { %451 = vadd.xlane.f32.xlu0 %v450_v46 }
 0x1ea   :  { %v879_v47 = vpop.eup %878 }
 0x1eb   :  { %v456_v48 = vsel %vm240_vm0, %v879_v47, 0.0 }
 0x1ed   :  { %457 = vadd.xlane.f32.xlu0 %v456_v48 }
 0x265   :  { %v437_v49 = vpop.xlane.xlu1 %436 }
 0x266   :  { %880 = vrcp.f32 %v437_v49 }
 0x269   :  { %v443_v50 = vpop.xlane.xlu1 %442 }
 0x26a   :  { %882 = vrcp.f32 %v443_v50  ;;  %v440_v51 = vpop.xlane.xlu0 %439 }
 0x26b   :  { %884 = vrcp.f32 %v440_v51  ;;  %v645_v51 = vld [vmem:[#allocation8] sm:$0xff] }
 0x26c   :  { %846 = vmatpush3.msra.mxu1 %v645_v51 }
 0x26d   :  { %v449_v52 = vpop.xlane.xlu1 %448 }
 0x26e   :  { %886 = vrcp.f32 %v449_v52  ;;  %v446_v53 = vpop.xlane.xlu0 %445  ;;  %v828_v52 = vld [vmem:[%s1183_s3] ss:$0 sm:$0xff] }
 0x26f   :  { %888 = vrcp.f32 %v446_v53 }
 0x271   :  { %v455_v54 = vpop.xlane.xlu1 %454 }
 0x272   :  { %890 = vrcp.f32 %v455_v54  ;;  %v452_v55 = vpop.xlane.xlu0 %451 }
 0x273   :  { %v881_v56 = vpop.eup %880  ;;  %892 = vrcp.f32 %v452_v55 }
 0x274   :  { %v475_v57 = vmul.f32 %v881_v56, %v865_v24 }
 0x276   :  { %v458_v58 = vpop.xlane.xlu0 %457  ;;  %v483_v59 = vmul.f32 %v475_v57, %v1071_v28 }
 0x277   :  { %v883_v60 = vpop.eup %882  ;;  %894 = vrcp.f32 %v458_v58  ;;  %v830_v58 = vld [vmem:[%s1185_s5] ss:$0 sm:$0xff]  ;;  %s976_s5 = scalar_lea.vmem %s818_s29, 128 }
 0x278   :  { %v885_v61 = vpop.eup %884  ;;  %v491_v62 = vsel %vm240_vm0, %v483_v59, 0.0  ;;  %v477_v63 = vmul.f32 %v883_v60, %v867_v27  ;;  %p977_p6 = scmp.ne.s32.totalorder %s818_s29, %s976_s5  ;;  %p982_p8 = scmp.lt.s32.totalorder %s976_s5, %s976_s5 }
 0x279   :  { %492 = vadd.xlane.f32.xlu1 %v491_v62  ;;  %v476_v0 = vmul.f32 %v885_v61, %v869_v29 }
 0x27a   :  { %v485_v1 = vmul.f32 %v477_v63, %v1073_v33  ;;  %p983_p9 = por %p982_p8, %p981_p7 }
 0x27b   :  { %v887_v2 = vpop.eup %886  ;;  %v484_v3 = vmul.f32 %v476_v0, %v1075_v34  ;;  %v832_v0 = vld [vmem:[%s1187_s7] ss:$0 sm:$0xff] }
 0x27c   :  { %v889_v4 = vpop.eup %888  ;;  %v497_v5 = vsel %vm240_vm0, %v485_v1, 0.0  ;;  %v479_v6 = vmul.f32 %v887_v2, %v871_v32  ;;  %p984_p10 = pnand %p983_p9, %p977_p6 }
 0x27d   :  { %498 = vadd.xlane.f32.xlu1 %v497_v5  ;;  %v494_v28 = vsel %vm240_vm0, %v484_v3, 0.0  ;;  %v478_v8 = vmul.f32 %v889_v4, %v873_v35 }
 0x27e   :  { %495 = vadd.xlane.f32.xlu0 %v494_v28  ;;  %v487_v9 = vmul.f32 %v479_v6, %v1077_v36 }
 0x27f   :  { %v891_v10 = vpop.eup %890  ;;  %v486_v11 = vmul.f32 %v478_v8, %v1079_v41 }
 0x280   :  { %v893_v12 = vpop.eup %892  ;;  %v503_v33 = vsel %vm240_vm0, %v487_v9, 0.0  ;;  %v481_v13 = vmul.f32 %v891_v10, %v875_v39 }
 0x281   :  { %504 = vadd.xlane.f32.xlu1 %v503_v33  ;;  %v500_v34 = vsel %vm240_vm0, %v486_v11, 0.0  ;;  %v480_v14 = vmul.f32 %v893_v12, %v877_v40 }
 0x282   :  { %501 = vadd.xlane.f32.xlu0 %v500_v34  ;;  %v489_v15 = vmul.f32 %v481_v13, %v1083_v43 }
 0x283   :  { %v488_v16 = vmul.f32 %v480_v14, %v1081_v42 }
 0x284   :  { %v895_v17 = vpop.eup %894  ;;  %v509_v18 = vsel %vm240_vm0, %v489_v15, 0.0 }
 0x285   :  { %510 = vadd.xlane.f32.xlu1 %v509_v18  ;;  %v506_v36 = vsel %vm240_vm0, %v488_v16, 0.0  ;;  %v482_v41 = vmul.f32 %v895_v17, %v879_v47 }
 0x286   :  { %507 = vadd.xlane.f32.xlu0 %v506_v36 }
 0x287   :  { %v490_v19 = vmul.f32 %v482_v41, %v1085_v45 }
 0x289   :  { %v512_v20 = vsel %vm240_vm0, %v490_v19, 0.0 }
 0x28a   :  { %513 = vadd.xlane.f32.xlu0 %v512_v20 }
 0x302   :  { %v493_v42 = vpop.xlane.xlu1 %492 }
 0x303   :  { %v534_v45 = vrot.slane %v493_v42, %v1069_v7 }
 0x306   :  { %v499_v43 = vpop.xlane.xlu1 %498 }
 0x307   :  { %v496_v23 = vpop.xlane.xlu0 %495  ;;  %v542_v25 = vrot.slane %v499_v43, %v1069_v7 }
 0x308   :  { %v538_v24 = vrot.slane %v496_v23, %v1069_v7 }
 0x30a   :  { %v563_v26 = vsel %vm316_vm2, %v538_v24, %v534_v45  ;;  %v505_v27 = vpop.xlane.xlu1 %504 }
 0x30b   :  { %v502_v29 = vpop.xlane.xlu0 %501  ;;  %v550_v31 = vrot.slane %v505_v27, %v1069_v7  ;;  %v564_v32 = vsel %vm317_vm3, %v542_v25, %v563_v26 }
 0x30c   :  { %v546_v30 = vrot.slane %v502_v29, %v1069_v7 }
 0x30e   :  { %v565_v35 = vsel %vm319_vm4, %v546_v30, %v564_v32  ;;  %v511_v37 = vpop.xlane.xlu1 %510 }
 0x30f   :  { %v508_v38 = vpop.xlane.xlu0 %507  ;;  %v558_v40 = vrot.slane %v511_v37, %v1069_v7  ;;  %v566_v44 = vsel %vm321_vm5, %v550_v31, %v565_v35 }
 0x310   :  { %v554_v39 = vrot.slane %v508_v38, %v1069_v7 }
 0x312   :  { %v567_v46 = vsel %vm323_vm6, %v554_v39, %v566_v44 }
 0x313   :  { %v514_v47 = vpop.xlane.xlu0 %513  ;;  %v568_v49 = vsel %vm325_vm7, %v558_v40, %v567_v46 }
 0x314   :  { %v562_v48 = vrot.slane %v514_v47, %v1069_v7  ;;  %v729_v7 = vld [vmem:[%s1186_s6] sm:$0xff] }
 0x316   :  { %v569_v50 = vsel %vm327_vm8, %v562_v48, %v568_v49 }
 0x317   :  { %843 = vmatmul.mubr.msk.f32.vlgmr.msra.gmra.mxu0 %vm240_vm0, %v569_v50 }
 0x318   :  { %852 = vmatprep.mubr.msk.f32.mxu0 %vm1010_vm1, %v1009_v22  ;;  %851 = vmatpush3.msra.mxu0 %v729_v7 }
 0x3d7   :  { %v638_v53 = vpop.f32.mrf.mxu0 }
 0x3d8   :  { %v639_v54 = vadd.f32 %v828_v52, %v638_v53 }
 0x3d9   :  { %v844_v55 = vpop.f32.mrf.mxu0 }
 0x3da   :  { %vm642_vm9 = vcmp.gt.f32.partialorder %v639_v54, 0.0  ;;  %v643_v56 = vmul.f32 0.01, %v639_v54 }
 0x3dc   :  { %v644_v57 = vsel %vm642_vm9, %v639_v54, %v643_v56 }
 0x3dd   :  { %848 = vmatmul.mubr.msk.f32.vlgmr.msra.gmra.mxu1 %vm240_vm0, %v644_v57 }
 0x49d   :  { %v722_v59 = vpop.f32.mrf.mxu1 }
 0x49e   :  { %v723_v60 = vadd.f32 %v830_v58, %v722_v59 }
 0x49f   :  { %v849_v61 = vpop.f32.mrf.mxu1 }
 0x4a0   :  { %vm726_vm10 = vcmp.gt.f32.partialorder %v723_v60, 0.0  ;;  %v727_v62 = vmul.f32 0.01, %v723_v60 }
 0x4a2   :  { %v728_v63 = vsel %vm726_vm10, %v723_v60, %v727_v62 }
 0x4a3   :  { %853 = vmatmul.mubr.msk.f32.vlgmr.msra.gmra.mxu0 %vm240_vm0, %v728_v63 }
 0x563   :  { %v806_v1 = vpop.f32.mrf.mxu0 }
 0x564   :  { %v807_v2 = vadd.f32 %v832_v0, %v806_v1 }
 0x565   :  { %v854_v3 = vpop.f32.mrf.mxu0 }
 0x566   :  { %810 = vst [vmem:[#allocation10] sm:$0xff] %v807_v2 }
 0x567   :  { %987 = shalt.err (!%p984_p10)
}
 0x568   :  { %820 = dma.vmem_to_hbm [thread:$0]  %s818_s29, 128, %s1188_s8, [#allocation4]  }
 0x569   :  { %1002 = dma.done.wait [#allocation4], 128  }
 0x56a   :  { %1003 = vsyncadd [#allocation4], 4294967168 }
 0x56b   :  { %824 = vsyncpa [#allocation3], 1 }
 0x56c   :  { %825 = vsyncpa [#allocation6], 1 }
 0x56d   :  { %826 = vsyncpa [#allocation9], 1 }
 0x56e   :  { %827 = vsyncpa [#allocation4], 1 }

</bundles_post_ra>
